<compile_context>
chip_gen: v5e
topology: v5e:2x2
jax: 0.10.0
libtpu: 0.0.40
codegen_flags: <defaults>
</compile_context>

<pallas_src>
import jax
import jax.numpy as jnp
from jax.experimental import pallas as pl
from jax.experimental.pallas import tpu as pltpu

# VMEM sizing (static, generation-safe):
#   * pipeline-buffer budget (2x double-buffer of in+out tiles): 24 MiB
#   * scoped VMEM limit handed to Mosaic: 48 MiB -- above the 16/32 MiB scoped
#     defaults (v5e / v6e-v7x), comfortably below v7x's 64 MiB physical VMEM
#     and far below the 128 MiB on v5e/v6e.
_PIPELINE_VMEM_BUDGET = 24 * 1024 * 1024
_VMEM_LIMIT_BYTES = 48 * 1024 * 1024


def _flatcat_kernel(x_ref, y_ref, o_ref):
    # x_ref: (bt, Nx), y_ref: (bt, Ny), o_ref: (bt, Nx+Ny) VMEM tiles.
    # torch.cat-style dtype promotion is folded into the stores: the VPU cast
    # is free in this memory-bound copy and avoids a separate full HBM
    # read+write pass for the promoted operand in the wrapper.
    nx = x_ref.shape[1]
    ny = y_ref.shape[1]
    o_ref[:, :nx] = x_ref[...].astype(o_ref.dtype)
    # NOTE: when nx % 128 != 0 this store starts at a non-lane-aligned offset;
    # that offset is inherent in the packed concat output layout.
    # TODO(synk): prototype an HBM->HBM direct-DMA variant (out memory_space=
    # pl.ANY + two make_async_copy into byte-offset slices) to remove the lane
    # rotation / VMEM round trip once non-tile-aligned HBM slices lower robustly.
    o_ref[:, nx:nx + ny] = y_ref[...].astype(o_ref.dtype)


def _sublane_multiple(itemsize):
    # Sub-32-bit dtypes pack along sublanes: 8 (f32), 16 (bf16/f16), 32 (int8/fp8).
    return max(8, 32 // max(1, itemsize))


def _pick_batch_tile(b, ntot, itemsize, *, vmem_budget_bytes, target_steps,
                     min_split_bytes):
    """Pick the batch (sublane) tile height.

    Live pipeline VMEM ~= 2 (double buffer) * bt * (Nx + Ny + Ntot) * itemsize
                       =  4 * bt * Ntot * itemsize.
    Returns None when no sublane-aligned tile fits the budget; the caller then
    falls back to XLA's fused concat instead of exceeding VMEM.
    """
    sublane = _sublane_multiple(itemsize)
    per_row_bytes = 4 * ntot * itemsize
    bt_budget = vmem_budget_bytes // per_row_bytes

    if bt_budget >= b:
        # Whole batch fits in one tile.  For large-enough payloads still split
        # into >= target_steps sublane-aligned tiles so the pipeline overlaps
        # DMA with the copy and v7x megacore sharding has >= 2 work items.
        if b >= target_steps * sublane and b * ntot * itemsize >= min_split_bytes:
            bt = (max(pl.cdiv(b, target_steps), sublane) // sublane) * sublane
            return max(sublane, min(bt, b))
        return b

    # Budget-constrained: interior tiles must be a sublane multiple.
    bt = (min(bt_budget, b) // sublane) * sublane
    if bt <= 0:
        return None  # even the minimal aligned tile blows the budget
    return bt


def flatcat_pallas(x, y, *, vmem_budget_bytes=_PIPELINE_VMEM_BUDGET,
                   target_steps=4, min_split_bytes=1 << 20):
    """torch.cat([x.flatten(1), y.flatten(1)], dim=1) as a Pallas TPU kernel."""
    assert x.shape[0] == y.shape[0], "batch dims must match"
    b = x.shape[0]
    out_dtype = jnp.result_type(x.dtype, y.dtype)

    # Flatten from dim 1; keep ORIGINAL dtypes (promotion happens in-kernel).
    x_flat = x.reshape(b, -1)
    y_flat = y.reshape(b, -1)
    nx = x_flat.shape[1]
    ny = y_flat.shape[1]
    ntot = nx + ny
    out_itemsize = jnp.dtype(out_dtype).itemsize

    bt = _pick_batch_tile(
        b, ntot, out_itemsize,
        vmem_budget_bytes=vmem_budget_bytes,
        target_steps=target_steps,
        min_split_bytes=min_split_bytes,
    )
    if bt is None:
        # Rows too wide for any sublane-aligned VMEM tile: fall back to XLA's
        # fused concat rather than blowing scoped/physical VMEM.
        # TODO(synk): add a lane-tiled (feature-axis) grid for this regime.
        return jnp.concatenate(
            [x_flat.astype(out_dtype), y_flat.astype(out_dtype)], axis=1)

    grid = (pl.cdiv(b, bt),)

    bytes_accessed = (
        b * nx * jnp.dtype(x.dtype).itemsize
        + b * ny * jnp.dtype(y.dtype).itemsize
        + b * ntot * out_itemsize
    )

    return pl.pallas_call(
        _flatcat_kernel,
        out_shape=jax.ShapeDtypeStruct((b, ntot), out_dtype),
        grid_spec=pltpu.PrefetchScalarGridSpec(
            num_scalar_prefetch=0,
            grid=grid,
            in_specs=[
                pl.BlockSpec((bt, nx), lambda i: (i, 0)),
                pl.BlockSpec((bt, ny), lambda i: (i, 0)),
            ],
            out_specs=pl.BlockSpec((bt, ntot), lambda i: (i, 0)),
        ),
        compiler_params=pltpu.CompilerParams(
            # Batch tiles are independent -> megacore sharding on v7x.
            dimension_semantics=("parallel",),
            vmem_limit_bytes=_VMEM_LIMIT_BYTES,
        ),
        cost_estimate=pl.CostEstimate(
            flops=0, transcendentals=0, bytes_accessed=bytes_accessed),
    )(x_flat, y_flat)


def flatcat(x, y, *, min_pallas_bytes=256 * 1024):
    """Dispatcher: tiny payloads go to XLA's fused concat (pure launch overhead
    otherwise); everything else goes through the Pallas kernel."""
    out_dtype = jnp.result_type(x.dtype, y.dtype)
    payload = (x.size + y.size) * jnp.dtype(out_dtype).itemsize
    if payload < min_pallas_bytes:
        b = x.shape[0]
        return jnp.concatenate(
            [x.reshape(b, -1).astype(out_dtype),
             y.reshape(b, -1).astype(out_dtype)], axis=1)
    return flatcat_pallas(x, y)


if __name__ == "__main__":
    key = jax.random.PRNGKey(0)
    kx, ky, kz = jax.random.split(key, 3)

    # 1) Shapes consistent with the module spec: x (N,4,2,2), y (N,3,2,2), N=2.
    x = jax.random.normal(kx, (2, 4, 2, 2), dtype=jnp.float32)
    y = jax.random.normal(ky, (2, 3, 2, 2), dtype=jnp.float32)
    out = jax.block_until_ready(flatcat_pallas(x, y))
    ref = jnp.concatenate([x.reshape(2, -1), y.reshape(2, -1)], axis=1)
    assert out.shape == (2, 4 * 2 * 2 + 3 * 2 * 2)
    assert out.dtype == ref.dtype
    assert jnp.array_equal(out, ref), "mismatch with reference (spec shapes)"

    # 2) Tiled path: multi-step pipelined grid + trailing partial batch tile
    #    (min_split_bytes=0 forces the split at this small test size).
    x2 = jax.random.normal(kx, (36, 4, 16, 16), dtype=jnp.float32)
    y2 = jax.random.normal(ky, (36, 3, 16, 16), dtype=jnp.float32)
    out2 = jax.block_until_ready(flatcat_pallas(x2, y2, min_split_bytes=0))
    ref2 = jnp.concatenate([x2.reshape(36, -1), y2.reshape(36, -1)], axis=1)
    assert jnp.array_equal(out2, ref2), "mismatch with reference (tiled path)"

    # 3) Mixed dtypes -> in-kernel promotion (torch.cat result_type semantics).
    x3 = jax.random.normal(kx, (2, 4, 2, 2), dtype=jnp.float32)
    y3 = jax.random.normal(kz, (2, 3, 2, 2), dtype=jnp.bfloat16)
    out3 = jax.block_until_ready(flatcat_pallas(x3, y3))
    ref3 = jnp.concatenate(
        [x3.reshape(2, -1).astype(jnp.float32),
         y3.reshape(2, -1).astype(jnp.float32)], axis=1)
    assert out3.dtype == jnp.float32
    assert jnp.array_equal(out3, ref3), "mismatch with reference (mixed dtype)"

    print("KERNEL_OK")
</pallas_src>

<mosaic_0001>
module attributes {stable_mosaic.version = 11 : i64} {
  func.func @_flatcat_kernel(%arg0: i32, %arg1: memref<2x16xf32, #tpu.memory_space<vmem>>, %arg2: memref<2x12xf32, #tpu.memory_space<vmem>>, %arg3: memref<2x28xf32, #tpu.memory_space<vmem>>) attributes {dimension_semantics = [#tpu.dimension_semantics<parallel>], iteration_bounds = array<i64: 1>, scalar_prefetch = 0 : i64, scratch_operands = 0 : i64, tpu.core_type = #tpu.core_type<tc>, window_params = [{transform_indices = @transform_0, window_bounds = array<i64: 2, 16>}, {transform_indices = @transform_1, window_bounds = array<i64: 2, 12>}, {transform_indices = @transform_2, window_bounds = array<i64: 2, 28>}]} {
    %c0 = arith.constant 0 : index
    %c0_0 = arith.constant 0 : index
    %0 = vector.load %arg1[%c0, %c0_0] : memref<2x16xf32, #tpu.memory_space<vmem>>, vector<2x16xf32>
    %c0_1 = arith.constant 0 : index
    %c0_2 = arith.constant 0 : index
    %1 = vector.load %arg3[%c0_1, %c0_2] : memref<2x28xf32, #tpu.memory_space<vmem>>, vector<2x16xf32>
    tpu.vector_store %arg3[%c0_1, %c0_2], %0 {strides = array<i32>} : memref<2x28xf32, #tpu.memory_space<vmem>>, vector<2x16xf32>,
    %c0_3 = arith.constant 0 : index
    %c0_4 = arith.constant 0 : index
    %2 = vector.load %arg2[%c0_3, %c0_4] : memref<2x12xf32, #tpu.memory_space<vmem>>, vector<2x12xf32>
    %c0_5 = arith.constant 0 : index
    %c16 = arith.constant 16 : index
    %3 = vector.load %arg3[%c0_5, %c16] : memref<2x28xf32, #tpu.memory_space<vmem>>, vector<2x12xf32>
    tpu.vector_store %arg3[%c0_5, %c16], %2 {strides = array<i32>} : memref<2x28xf32, #tpu.memory_space<vmem>>, vector<2x12xf32>,
    return
  }
  func.func @transform_0(%arg0: i32) -> (i32, i32) {
    %c0_i32 = arith.constant 0 : i32
    %c0_i32_0 = arith.constant 0 : i32
    return %arg0, %c0_i32 : i32, i32
  }
  func.func @transform_1(%arg0: i32) -> (i32, i32) {
    %c0_i32 = arith.constant 0 : i32
    %c0_i32_0 = arith.constant 0 : i32
    return %arg0, %c0_i32 : i32, i32
  }
  func.func @transform_2(%arg0: i32) -> (i32, i32) {
    %c0_i32 = arith.constant 0 : i32
    %c0_i32_0 = arith.constant 0 : i32
    return %arg0, %c0_i32 : i32, i32
  }
}

</mosaic_0001>

<bundles_post_ra>
// kernel: tpu_custom_call.1
= control target key start
LH: loop header
LB: loop body
LE: loop exit
PB: predicated region body
PF: predicated region fallthrough
CT: control target
= control target key end

     0   :  { %7 = vsyncpa [#allocation3], 0  ;;  %s178_s0 = inlined_call_operand.hbm [shape: f32[2,16], index: 0, kind: input, shape index: {}]   ;;  %s179_s1 = inlined_call_operand.hbm [shape: f32[2,12], index: 1, kind: input, shape index: {}]   ;;  %s180_s2 = inlined_call_operand.hbm [shape: f32[2,28], index: 2, kind: output, shape index: {}]  }
   0x1   :  { %8 = vsyncpa [#allocation6], 0 }
   0x2   :  { %9 = vsyncpa [#allocation4], 0  ;;  %s15_s11 = sshll.u32 %s178_s0, 4  ;;  %s150_s12 = smov [#allocation2]   ;;  %s16_s11 = int_to_ptr.hbm [resolvable:$true] %s15_s11 }
   0x3   :  { %s17_s13 = sshll.u32 %s150_s12, 4  ;;  %s26_s16 = sshll.u32 %s179_s1, 4  ;;  %s18_s13 = int_to_ptr.vmem [resolvable:$true] %s17_s13  ;;  %s27_s16 = int_to_ptr.hbm [resolvable:$true] %s26_s16 }
   0x4   :  { %20 = dma.hbm_to_vmem [thread:$0]  %s16_s11, 32, %s18_s13, [#allocation3]  }
   0x5   :  { %s151_s17 = smov [#allocation5]  }
   0x6   :  { %s28_s18 = sshll.u32 %s151_s17, 4  ;;  %s29_s18 = int_to_ptr.vmem [resolvable:$true] %s28_s18 }
   0x7   :  { %31 = dma.hbm_to_vmem [thread:$0]  %s27_s16, 32, %s29_s18, [#allocation6]  }
   0x8   :  { %144 = dma.done.wait [#allocation3], 32  }
   0x9   :  { %145 = vsyncadd [#allocation3], 4294967264 }
   0xa   :  { %146 = dma.done.wait [#allocation6], 32  }
   0xb   :  { %147 = vsyncadd [#allocation6], 4294967264  ;;  %vm41_vm0 = vcmask 123904   ;;  %v40_v0 = vld [vmem:[#allocation2] sm:$0x3]  ;;  %s152_s0 = smov 16  }
   0xc   :  { %v43_v1 = vld [vmem:[#allocation5] sm:$0x3]  ;;  %42 = vst.msk [vmem:[#allocation7] sm:$0x3] %vm41_vm0, %v40_v0  ;;  %s153_s19 = smov [#allocation7]   ;;  %s57_s22 = sshll.u32 %s180_s2, 4  ;;  %s58_s22 = int_to_ptr.hbm [resolvable:$true] %s57_s22 }
   0xd   :  { %45 = vrot.lane.b32.xlu0 %v43_v1, %s152_s0  ;;  %s55_s20 = sshll.u32 %s153_s19, 4  ;;  %vm48_vm1 = vcmask 222336   ;;  %s56_s20 = int_to_ptr.vmem [resolvable:$true] %s55_s20 }
  0x7f   :  { %v46_v2 = vpop.permute.xlu0 %45 }
  0x80   :  { %49 = vst.msk [vmem:[#allocation7] sm:$0x3] %vm48_vm1, %v46_v2 }
  0x81   :  { %60 = dma.vmem_to_hbm [thread:$0]  %s56_s20, 32, %s58_s22, [#allocation4]  }
  0x82   :  { %148 = dma.done.wait [#allocation4], 32  }
  0x83   :  { %149 = vsyncadd [#allocation4], 4294967264 }
  0x84   :  { %65 = vsyncpa [#allocation3], 1 }
  0x85   :  { %66 = vsyncpa [#allocation6], 1 }
  0x86   :  { %67 = vsyncpa [#allocation4], 1 }

</bundles_post_ra>
